<compile_context>
chip_gen: v6e
topology: v6e:2x2x1
jax: 0.10.0
libtpu: 0.0.40
codegen_flags: <defaults>
</compile_context>

<pallas_src>
import jax
import jax.numpy as jnp
from jax.experimental import pallas as pl
from jax.experimental.pallas import tpu as pltpu


def _locked_dropout_kernel(x_ref, m_ref, o_ref):
    # x_ref: (tT, H) time-tile of one batch element (batch dim squeezed).
    # m_ref: (1, H) per-batch mask, already scaled by 1/(1-p) and in x.dtype.
    # Broadcast-multiply over the time axis; astype is a no-op when dtypes match.
    o_ref[...] = (x_ref[...] * m_ref[...]).astype(o_ref.dtype)


def _vmem_budget_bytes():
    """Generation-aware VMEM budget used both for tile sizing and as the
    explicit vmem_limit_bytes.  Leaves >= 1/3 of physical VMEM as headroom
    (v5e/v6e: 128 MiB physical -> 48 MiB budget; v7x: 64 MiB -> ~42 MiB)."""
    try:
        physical = int(pltpu.get_tpu_info().vmem_capacity_bytes)
    except Exception:
        physical = 64 * 1024 * 1024  # conservative fallback (v7x per-TC VMEM)
    return int(min(48 * 1024 * 1024, (physical * 2) // 3))


def _pick_time_tile(B, T, H, dtype, target_block_bytes):
    """Pick a sublane-aligned time tile so one (tT, H) block is ~target bytes.
    Live VMEM is ~4x the block (double-buffered in + out) plus the tiny mask,
    which stays well inside the budget passed as vmem_limit_bytes."""
    itemsize = jnp.dtype(dtype).itemsize
    mult = {4: 8, 2: 16, 1: 32}.get(itemsize, 8)  # sublane alignment
    if T <= mult:
        return T  # full time axis as one block (full-dim block is legal)
    rows = max(mult, target_block_bytes // max(1, H * itemsize))
    tt = min(T, max(mult, (rows // mult) * mult))
    # Megacore: v7x has 2 TensorCores.  When B == 1 make sure there are at
    # least 2 time tiles so both cores get work and the pipeline has depth.
    if B == 1 and pl.cdiv(T, tt) < 2:
        half = (T + 1) // 2
        tt = min(T, max(mult, ((half + mult - 1) // mult) * mult))
    return tt


def locked_dropout(x, dropout, key, training=True, donate=False):
    """JAX/Pallas equivalent of LockedDropout.forward."""
    if (not training) or dropout == 0.0:
        return x
    if dropout >= 1.0:
        # keep_prob == 0: every unit is dropped.  (The PyTorch module would
        # emit NaNs from 0/0 here; all-zeros is the well-defined limit.)
        return jnp.zeros_like(x)

    B, T, H = x.shape
    keep_prob = 1.0 - float(dropout)

    # One Bernoulli(1-p) per (batch, hidden), shared across time, scaled by
    # 1/(1-p).  Bernoulli values stay exact 0/1; only the scale rounds when
    # x.dtype is bf16 -> the kernel datapath stays in x.dtype (halves vreg
    # pressure / VALU work on v6e/v7x relative to an f32 mask).
    mask = jax.random.bernoulli(key, p=keep_prob, shape=(B, 1, H))
    mask = (mask.astype(jnp.float32) * (1.0 / keep_prob)).astype(x.dtype)

    budget = _vmem_budget_bytes()
    tT = _pick_time_tile(B, T, H, x.dtype, budget // 6)
    grid = (B, pl.cdiv(T, tT))

    itemsize = jnp.dtype(x.dtype).itemsize
    cost = pl.CostEstimate(
        flops=B * T * H,
        transcendentals=0,
        bytes_accessed=2 * B * T * H * itemsize + B * H * itemsize,
    )

    # NOTE: keep H a multiple of 128 (BERT hidden sizes are) so the output
    # last dim stays lane-dense (unmasked vst); other H still runs correctly
    # but falls back to masked partial stores.
    return pl.pallas_call(
        _locked_dropout_kernel,
        out_shape=jax.ShapeDtypeStruct((B, T, H), x.dtype),
        grid=grid,
        in_specs=[
            # x: squeeze batch, tile time, keep H lane-dense (full last dim).
            pl.BlockSpec((None, tT, H), lambda b, t: (b, t, 0)),
            # mask: one (1, H) row per batch element, reused across all t tiles.
            pl.BlockSpec((None, 1, H), lambda b, t: (b, 0, 0)),
        ],
        out_specs=pl.BlockSpec((None, tT, H), lambda b, t: (b, t, 0)),
        compiler_params=pltpu.CompilerParams(
            # No carried state between grid steps -> both axes parallel
            # (lets Mosaic shard across both TensorCores on v7x).
            dimension_semantics=("parallel", "parallel"),
            vmem_limit_bytes=budget,
        ),
        cost_estimate=cost,
        # Only safe when the caller donates x (activation not reused).
        input_output_aliases=({0: 0} if donate else {}),
    )(x, mask)


if __name__ == "__main__":
    key = jax.random.PRNGKey(0)
    kx, km, kx2, km2 = jax.random.split(key, 4)
    dropout_p = 0.25
    scale = 1.0 / (1.0 - dropout_p)

    # --- Case 1: small BERT-like batch (grid parallel over batch), f32. ---
    B, T, H = 4, 8, 128
    x = jax.random.normal(kx, (B, T, H), dtype=jnp.float32)
    out = jax.block_until_ready(locked_dropout(x, dropout_p, km, training=True))
    assert out.shape == x.shape and out.dtype == x.dtype
    # Mask is "locked" across time: each (b, h) column is either all-dropped
    # (exact zeros) or all-kept (x * scale).
    is_zero = jnp.all(jnp.abs(out) == 0.0, axis=1)
    is_kept = jnp.all(jnp.abs(out - x * scale) < 1e-5, axis=1)
    assert bool(jnp.all(jnp.logical_or(is_zero, is_kept)))

    # --- Case 2: B == 1, bf16, partial last time tile (exercises the
    #     megacore split path and block padding on the ragged tail). ---
    x2 = jax.random.normal(kx2, (1, 13, 128), dtype=jnp.bfloat16)
    out2 = jax.block_until_ready(locked_dropout(x2, dropout_p, km2, training=True))
    assert out2.shape == x2.shape and out2.dtype == x2.dtype
    exp2 = (x2.astype(jnp.float32) * float(jnp.asarray(scale, jnp.bfloat16)))
    zero2 = jnp.all(out2.astype(jnp.float32) == 0.0, axis=1)
    kept2 = jnp.all(jnp.abs(out2.astype(jnp.float32) - exp2) < 5e-2, axis=1)
    assert bool(jnp.all(jnp.logical_or(zero2, kept2)))

    # --- Case 3: eval mode is identity. ---
    out_eval = jax.block_until_ready(locked_dropout(x, dropout_p, km, training=False))
    assert bool(jnp.array_equal(out_eval, x))

    print("KERNEL_OK")
</pallas_src>

<mosaic_0001>
module attributes {stable_mosaic.version = 11 : i64} {
  func.func @_locked_dropout_kernel(%arg0: i32, %arg1: i32, %arg2: memref<1x8x128xf32, #tpu.memory_space<vmem>>, %arg3: memref<1x1x128xf32, #tpu.memory_space<vmem>>, %arg4: memref<1x8x128xf32, #tpu.memory_space<vmem>>) attributes {dimension_semantics = [#tpu.dimension_semantics<parallel>, #tpu.dimension_semantics<parallel>], iteration_bounds = array<i64: 4, 1>, scalar_prefetch = 0 : i64, scratch_operands = 0 : i64, tpu.core_type = #tpu.core_type<tc>, window_params = [{transform_indices = @transform_0, window_bounds = array<i64: 1, 8, 128>}, {transform_indices = @transform_1, window_bounds = array<i64: 1, 1, 128>}, {transform_indices = @transform_2, window_bounds = array<i64: 1, 8, 128>}]} {
    %c0 = arith.constant 0 : index
    %c0_0 = arith.constant 0 : index
    %c0_1 = arith.constant 0 : index
    %0 = vector.load %arg2[%c0, %c0_0, %c0_1] : memref<1x8x128xf32, #tpu.memory_space<vmem>>, vector<1x8x128xf32>
    %1 = vector.shape_cast %0 : vector<1x8x128xf32> to vector<8x128xf32>
    %c0_2 = arith.constant 0 : index
    %c0_3 = arith.constant 0 : index
    %c0_4 = arith.constant 0 : index
    %2 = vector.load %arg3[%c0_2, %c0_3, %c0_4] : memref<1x1x128xf32, #tpu.memory_space<vmem>>, vector<1x1x128xf32>
    %3 = vector.shape_cast %2 : vector<1x1x128xf32> to vector<1x128xf32>
    %4 = vector.broadcast %3 : vector<1x128xf32> to vector<8x128xf32>
    %5 = arith.mulf %1, %4 : vector<8x128xf32>
    %c0_5 = arith.constant 0 : index
    %c0_6 = arith.constant 0 : index
    %c0_7 = arith.constant 0 : index
    %6 = vector.load %arg4[%c0_5, %c0_6, %c0_7] : memref<1x8x128xf32, #tpu.memory_space<vmem>>, vector<1x8x128xf32>
    %7 = vector.shape_cast %6 : vector<1x8x128xf32> to vector<8x128xf32>
    %8 = vector.shape_cast %5 : vector<8x128xf32> to vector<1x8x128xf32>
    tpu.vector_store %arg4[%c0_5, %c0_6, %c0_7], %8 {strides = array<i32>} : memref<1x8x128xf32, #tpu.memory_space<vmem>>, vector<1x8x128xf32>,
    return
  }
  func.func @transform_0(%arg0: i32, %arg1: i32) -> (i32, i32, i32) {
    %c0_i32 = arith.constant 0 : i32
    %c0_i32_0 = arith.constant 0 : i32
    return %arg0, %arg1, %c0_i32 : i32, i32, i32
  }
  func.func @transform_1(%arg0: i32, %arg1: i32) -> (i32, i32, i32) {
    %c0_i32 = arith.constant 0 : i32
    %c0_i32_0 = arith.constant 0 : i32
    %c0_i32_1 = arith.constant 0 : i32
    return %arg0, %c0_i32, %c0_i32_0 : i32, i32, i32
  }
  func.func @transform_2(%arg0: i32, %arg1: i32) -> (i32, i32, i32) {
    %c0_i32 = arith.constant 0 : i32
    %c0_i32_0 = arith.constant 0 : i32
    return %arg0, %arg1, %c0_i32 : i32, i32, i32
  }
}

</mosaic_0001>

<bundles_post_ra>
// kernel: tpu_custom_call.1
= control target key start
LH: loop header
LB: loop body
LE: loop exit
PB: predicated region body
PF: predicated region fallthrough
CT: control target
= control target key end

     0   :  { %7 = vsyncpa [#allocation3], 0  ;;  %s739_s0 = inlined_call_operand.hbm [shape: f32[4,8,128], index: 0, kind: input, shape index: {}]   ;;  %s740_s1 = inlined_call_operand.hbm [shape: f32[4,1,128], index: 1, kind: input, shape index: {}]   ;;  %s741_s2 = inlined_call_operand.hbm [shape: f32[4,8,128], index: 2, kind: output, shape index: {}]  }
   0x1   :  { %9 = vsyncpa [#allocation3 + $0x1], 0 }
   0x2   :  { %10 = vsyncpa [#allocation6], 0 }
   0x3   :  { %12 = vsyncpa [#allocation6 + $0x1], 0 }
   0x4   :  { %13 = vsyncpa [#allocation4], 0 }
   0x5   :  { %15 = vsyncpa [#allocation4 + $0x1], 0  ;;  %s577_s9 = smov 0   ;;  %s579_s10 = smov 0  }
   0x6   :  { %s581_s11 = smov 0   ;;  %s583_s12 = smov 0  }
   0x7   :  { %s585_s13 = smov 0   ;;  %s587_s14 = smov 0  }
   0x8 LB: > { %s335_s15 = sadd.s32 4294967295, %s557_s14   ;;  %s336_s16 = sadd.s32 4294967294, %s557_s14   ;;  %s557_s14 = sphi %s587_s14, %s21_s14   ;;  %s553_s13 = sphi %s585_s13, %s752_s13   ;;  %s549_s12 = sphi %s583_s12, %s751_s12   ;;  %s545_s11 = sphi %s581_s11, %s750_s11   ;;  %s541_s10 = sphi %s579_s10, %s749_s10   ;;  %s537_s9 = sphi %s577_s9, %s748_s9  }
   0x9   : > { %s33_s17 = sadd.s32 1, %s553_s13  ;;  %s42_s18 = sadd.s32 1, %s545_s11 }
   0xa   : > { %p35_p0 = scmp.ge.s32.totalorder %s33_s17, 4  ;;  %p49_p1 = scmp.ne.s32.totalorder %s545_s11, %s541_s10 }
   0xb   : > { %p50_p2 = scmp.eq.s32.totalorder %s557_s14, 0  ;;  %p55_p3 = scmp.ne.s32.totalorder %s541_s10, %s537_s9 }
   0xc   : > { %s754_s17 = smov (%p35_p0, %s33_s17), 0  ;;  %p56_p5 = scmp.eq.s32.totalorder %s335_s15, 0 }
   0xd   : > { %p618_p4 = por %p50_p2, %p49_p1  ;;  %s37_s20 = ssub.s32 %s553_s13, %s754_s17 }
   0xe   : > { %p107_p6 = scmp.eq.s32.totalorder %s335_s15, 3  ;;  %p40_p7 = scmp.eq.s32.totalorder %s37_s20, 0 }
   0xf   : > { %p624_p8 = por %p56_p5, %p55_p3  ;;  %p113_p10 = scmp.eq.s32.totalorder %s336_s16, 3 }
  0x10   : > { %p628_p9 = por %p107_p6, %p49_p1  ;;  %p367_p12 = scmp.lt.s32.totalorder %s557_s14, 4 }
  0x11   : > { %s633_s23 = scalar_select %p40_p7, %s545_s11, %s42_s18  }
  0x12   : > { %p635_p11 = por %p113_p10, %p55_p3  ;;  %s641_s25 = sand.u32 1, %s545_s11  }
  0x13   : > { %s339_s26 = sshll.u32 %s641_s25, 3  ;;  %s340_s27 = sshll.u32 %s553_s13, 7 }
  0x14   : > { %s143_s30 = scalar_lea.hbm %s739_s0, %s340_s27  ;;  %s137_s3 = scalar_lea.vmem [#allocation2], %s339_s26 }
  0x15   : > { %s145_s4 = sshll.u32 %s137_s3, 4  ;;  %p650_p13 = pnand %p367_p12, %p618_p4  ;;  %s146_s4 = int_to_ptr.vmem [resolvable:$true] %s145_s4 }
  0x16   : > { %p342_p0 = scmp.ge.s32.totalorder %s557_s14, 1  ;;  %p167_p1 = scmp.lt.s32.totalorder %s557_s14, 5 }
  0x17   : > { %s134_s6 = scalar_lea.sflag [#allocation3], %s641_s25  ;;  %p419_p2 = pneg %p650_p13 }
  0x18   : > { %s430_s7 = scalar_lea.vmem %s146_s4, 128  ;;  %s559_s8 = smov [#allocation2]  }
  0x19   : > { %p431_p3 = scmp.ne.s32.totalorder %s146_s4, %s430_s7  ;;  %s435_s15 = sshll.u32 %s559_s8, 4  ;;  %s436_s15 = int_to_ptr.vmem [resolvable:$false] %s435_s15 }
  0x1a   : > { %s437_s16 = scalar_lea.vmem %s436_s15, 256  ;;  %p438_p4 = scmp.lt.s32.totalorder %s146_s4, %s436_s15 }
  0x1b   : > { %p433_p5 = pnand %p431_p3, %p419_p2  ;;  %p439_p7 = scmp.lt.s32.totalorder %s437_s16, %s430_s7 }
  0x1d   : > { %p434_p6 = pneg %p433_p5  ;;  %p440_p10 = por %p439_p7, %p438_p4 }
  0x1f   : > { %p441_p12 = pnand %p440_p10, %p434_p6 }
  0x21   : > { %444 = shalt.err (!%p441_p12)
}
  0x22   : > { %359 = dma.hbm_to_vmem [thread:$0]  (!%p650_p13), %s143_s30, 128, %s146_s4, %s134_s6  }
  0x23   : > { %p668_p3 = pnand %p342_p0, %p167_p1  ;;  %s341_s19 = sshll.u32 %s553_s13, 4 }
  0x24   : > { %s155_s20 = scalar_lea.vmem [#allocation5], %s641_s25  ;;  %s160_s29 = scalar_lea.hbm %s740_s1, %s341_s19 }
  0x25   : > { %s162_s26 = sshll.u32 %s155_s20, 4  ;;  %s153_s3 = scalar_lea.sflag [#allocation6], %s641_s25  ;;  %s163_s26 = int_to_ptr.vmem [resolvable:$true] %s162_s26 }
  0x26   : > { %s458_s7 = scalar_lea.vmem %s163_s26, 16  ;;  %s560_s30 = smov [#allocation5]  }
  0x27   : > { %p459_p5 = scmp.ne.s32.totalorder %s163_s26, %s458_s7  ;;  %s463_s4 = sshll.u32 %s560_s30, 4  ;;  %s464_s4 = int_to_ptr.vmem [resolvable:$false] %s463_s4 }
  0x28   : > { %s465_s6 = scalar_lea.vmem %s464_s4, 32  ;;  %p466_p0 = scmp.lt.s32.totalorder %s163_s26, %s464_s4 }
  0x29   : > { %p461_p6 = pnand %p459_p5, %p419_p2  ;;  %p467_p1 = scmp.lt.s32.totalorder %s465_s6, %s458_s7 }
  0x2b   : > { %p462_p4 = pneg %p461_p6  ;;  %p468_p7 = por %p467_p1, %p466_p0 }
  0x2d   : > { %p469_p10 = pnand %p468_p7, %p462_p4 }
  0x2f   : > { %472 = shalt.err (!%p469_p10)
}
  0x30   : > { %362 = dma.hbm_to_vmem [thread:$0]  (!%p650_p13), %s160_s29, 16, %s163_s26, %s153_s3  }
  0x31   : > { %171 = sbr.rel (%p668_p3) target bundleno = 81 (0x51), region = 28  ;;  %s686_s25 = sand.u32 (!%p668_p3), 1, %s541_s10  }
  0x32   : > { %s343_s8 = sshll.u32 (!%p668_p3), %s686_s25, 3  ;;  %s174_s15 = scalar_lea.sflag (!%p668_p3), [#allocation3], %s686_s25 }
  0x33   : > { %s177_s16 = scalar_lea.vmem (!%p668_p3), [#allocation2], %s343_s8 }
  0x36   : > { %524 = dma.done.wait (%p624_p8), %s174_s15, 128  }
  0x37   : > { %526 = vsyncadd (%p624_p8), %s174_s15, 4294967168  ;;  %s183_s5 = scalar_lea.sflag [#allocation6], %s686_s25  ;;  %s185_s18 = scalar_lea.vmem [#allocation5], %s686_s25 }
  0x38   : > { %528 = dma.done.wait (%p624_p8), %s183_s5, 16  }
  0x39   : > { %530 = vsyncadd (%p624_p8), %s183_s5, 4294967280  ;;  %s209_s19 = scalar_lea.vmem [#allocation7], %s343_s8  ;;  %s347_s26 = sshll.u32 %s549_s12, 7  ;;  %v210_v0 = vld [vmem:[%s177_s16] sm:$0xff] }
  0x3a   : > { %s235_s20 = sshll.u32 %s209_s19, 4  ;;  %v345_v1 = vld [vmem:[%s185_s18] ss:$0 sm:$0xff]  ;;  %s233_s29 = scalar_lea.hbm %s741_s2, %s347_s26  ;;  %s236_s20 = int_to_ptr.vmem [resolvable:$true] %s235_s20 }
  0x3b   : > { %v218_v2 = vmul.f32 %v345_v1, %v210_v0  ;;  %s221_s3 = scalar_lea.sflag [#allocation4], %s686_s25  ;;  %s473_s7 = scalar_lea.vmem %s236_s20, 128 }
  0x3c   : > { %p474_p13 = scmp.ne.s32.totalorder %s236_s20, %s473_s7  ;;  %s561_s21 = smov [#allocation7]  }
  0x3d   : > { %219 = vst [vmem:[%s209_s19] sm:$0xff] %v218_v2  ;;  %s477_s30 = sshll.u32 %s561_s21, 4  ;;  %s478_s30 = int_to_ptr.vmem [resolvable:$false] %s477_s30 }
  0x3e   : > { %p475_p8 = pnand %p474_p13, %p628_p9  ;;  %s479_s4 = scalar_lea.vmem %s478_s30, 256 }
  0x3f   : > { %p480_p12 = scmp.lt.s32.totalorder %s236_s20, %s478_s30  ;;  %p481_p3 = scmp.lt.s32.totalorder %s479_s4, %s473_s7 }
  0x40   : > { %p476_p2 = pneg %p475_p8 }
  0x41   : > { %p482_p5 = por %p481_p3, %p480_p12 }
  0x43   : > { %p483_p6 = pnand %p482_p5, %p476_p2 }
  0x45   : > { %486 = shalt.err (!%p483_p6)
}
  0x46   : > { %s487_s12 = scalar_lea.hbm %s233_s29, 128  ;;  %s491_s8 = scalar_lea.hbm %s741_s2, 512 }
  0x47   : > { %p488_p4 = scmp.ne.s32.totalorder %s233_s29, %s487_s12  ;;  %p492_p7 = scmp.lt.s32.totalorder %s233_s29, %s741_s2 }
  0x48   : > { %p493_p10 = scmp.lt.s32.totalorder %s491_s8, %s487_s12 }
  0x49   : > { %p489_p0 = pnand %p488_p4, %p628_p9 }
  0x4a   : > { %p494_p13 = por %p493_p10, %p492_p7 }
  0x4b   : > { %p490_p1 = pneg %p489_p0 }
  0x4d   : > { %p495_p8 = pnand %p494_p13, %p490_p1 }
  0x4f   : > { %498 = shalt.err (!%p495_p8)
}
  0x50   : > { %354 = dma.vmem_to_hbm [thread:$0]  (%p628_p9), %s236_s20, 128, %s233_s29, %s221_s3  }
  0x51 PF: > { %p368_p2 = scmp.ge.s32.totalorder %s557_s14, 2  ;;  %s247_s5 = sand.u32 1, %s537_s9  }
  0x52   : > { %s248_s18 = scalar_lea.sflag [#allocation4], %s247_s5 }
  0x53   : > { %p364_p12 = pnand %p368_p2, %p635_p11 }
  0x55   : > { %p365_p3 = pneg %p364_p12 }
  0x57   : > { %532 = dma.done.wait (%p365_p3), %s248_s18, 128  }
  0x58   : > { %534 = vsyncadd (%p365_p3), %s248_s18, 4294967168  ;;  %s21_s14 = sadd.s32 1, %s557_s14   ;;  %s748_s9 = smov %s541_s10 }
  0x59   : > { %p18_p5 = scmp.ge.s32.totalorder %s21_s14, 6   ;;  %s749_s10 = smov %s545_s11 }
  0x5a   : > { %s750_s11 = smov %s633_s23  ;;  %s751_s12 = smov %s553_s13 }
  0x5b   : > { %s752_s13 = smov %s754_s17  ;;  %20 = sbr.rel (!%p18_p5) target bundleno = 8 (0x8), region = 86 }
  0x60   :  { %253 = vsyncpa [#allocation3], 1 }
  0x61   :  { %255 = vsyncpa [#allocation3 + $0x1], 1 }
  0x62   :  { %256 = vsyncpa [#allocation6], 1 }
  0x63   :  { %258 = vsyncpa [#allocation6 + $0x1], 1 }
  0x64   :  { %259 = vsyncpa [#allocation4], 1 }
  0x65   :  { %261 = vsyncpa [#allocation4 + $0x1], 1 }

</bundles_post_ra>
